<compile_context>
chip_gen: v6e
topology: v6e:2x2x1
jax: 0.10.0
libtpu: 0.0.40
codegen_flags: <defaults>
</compile_context>

<pallas_src>
import numpy as np
import jax
import jax.numpy as jnp
from jax import lax
from jax.experimental import pallas as pl
from jax.experimental.pallas import tpu as pltpu


# ----------------------------- static constants -----------------------------

def _flat_pool2_matrix(h, w):
    """(h//2*w//2, h*w): 2x2 average pooling acting on row-major flattened maps."""
    ho, wo = h // 2, w // 2
    m = np.zeros((ho * wo, h * w), np.float32)
    for y in range(h):
        for x in range(w):
            m[(y // 2) * wo + (x // 2), y * w + x] = 0.25
    return m


def _flat_conv_shift_mats(h, w):
    """(9, h*w, h*w): S[t, p_out, p_in] = 1 where p_in is the (dy,dx) neighbour of
    output position p_out for a 3x3 'same' conv (t = dy*3+dx); missing = padding."""
    s = np.zeros((9, h * w, h * w), np.float32)
    for dy in range(3):
        for dx in range(3):
            t = dy * 3 + dx
            for yp in range(h):
                for xp in range(w):
                    yi, xi = yp + dy - 1, xp + dx - 1
                    if 0 <= yi < h and 0 <= xi < w:
                        s[t, yp * w + xp, yi * w + xi] = 1.0
    return s


def _flat_adaptive_matrix(h, w, oh, ow):
    """(oh*ow, h*w): AdaptiveAvgPool2d bin-averaging on flattened maps
    (PyTorch floor/ceil bin boundaries)."""
    m = np.zeros((oh * ow, h * w), np.float32)
    for i in range(oh):
        hs, he = (i * h) // oh, -(-((i + 1) * h) // oh)
        for j in range(ow):
            ws, we = (j * w) // ow, -(-((j + 1) * w) // ow)
            inv = 1.0 / ((he - hs) * (we - ws))
            for y in range(hs, he):
                for x in range(ws, we):
                    m[i * ow + j, y * w + x] = inv
    return m


def _im2col_plus_ones(x):
    """(N,C,H,W) -> (N, C*9+1, H*W): im2col rows for a 3x3 'same' conv
    (row index = ci*9 + dy*3 + dx) plus a ones row so the conv bias folds into
    the weight matmul."""
    n, c, h, w = x.shape
    xp = jnp.pad(x, ((0, 0), (0, 0), (1, 1), (1, 1)))
    taps = [xp[:, :, dy:dy + h, dx:dx + w] for dy in range(3) for dx in range(3)]
    patches = jnp.stack(taps, axis=2).reshape(n, c * 9, h * w)
    ones = jnp.ones((n, 1, h * w), patches.dtype)
    return jnp.concatenate([patches, ones], axis=1).astype(jnp.float32)


# --------------------------------- kernel -----------------------------------

def _make_fused_kernel(c1):
    """Single grid step; whole batch folded into the lane axis.

    xp_ref  : (Cin*9+1, N*H1W1)        pooled im2col (+ones row)
    w1_ref  : (C1, Cin*9+1)            conv1 weights with bias column
    b_ref   : (C1, N*H1W1, N*Cout*H2W2) conv2 taps + 2x2 pool, block-diag over N
    b2_ref  : (1, N*Cout*H2W2)         conv2 bias broadcast row
    gap_ref : (N*Cout*H2W2, N*Cout*oh*ow)  block-diag adaptive avg-pool
    o_ref   : (1, N*Cout*oh*ow)        lane-flat output slab
    """

    def kernel(xp_ref, w1_ref, b_ref, b2_ref, gap_ref, o_ref):
        # stage 1: relu(pool2(conv1(x)+b1))  — pool already folded into xp
        h1 = jnp.maximum(
            jnp.dot(w1_ref[...], xp_ref[...],
                    preferred_element_type=jnp.float32), 0.0)        # (C1, N*H1W1)

        # stage 2: pool2(conv2(h1))   (conv2 taps + pool folded into b_ref)
        pooled = jnp.dot(h1[0:1, :], b_ref[0],
                         preferred_element_type=jnp.float32)         # (1, N*Cout*H2W2)
        for ci in range(1, c1):
            pooled = pooled + jnp.dot(h1[ci:ci + 1, :], b_ref[ci],
                                      preferred_element_type=jnp.float32)

        act = jnp.maximum(pooled + b2_ref[...], 0.0)                  # + b2, relu
        # adaptive GAP, lane-flat store
        o_ref[...] = jnp.dot(act, gap_ref[...],
                             preferred_element_type=jnp.float32)      # (1, N*Cout*oh*ow)

    return kernel


# -------------------------------- wrapper ------------------------------------

def nin_gap_forward(x, w1, b1, w2, b2, out_shape=(2, 3)):
    n, cin, h, wd = x.shape
    c1, cout = w1.shape[0], w2.shape[0]
    h1s, w1s = h // 2, wd // 2            # spatial after stage-1 pool
    h2s, w2s = h1s // 2, w1s // 2         # spatial after stage-2 pool
    oh, ow = out_shape
    hw1, hw2, og = h1s * w1s, h2s * w2s, oh * ow
    hi = lax.Precision.HIGHEST

    # ---- glue: all linear preprocessing folded into small constant operators ----
    # stage-1 operand: im2col (+ones) pooled by P1, batch folded into lanes
    xcols = _im2col_plus_ones(x)                                      # (N, Cin*9+1, H*W)
    p1t = jnp.asarray(_flat_pool2_matrix(h, wd).T)                    # (H*W, H1W1)
    xp = jnp.einsum('nkp,pq->knq', xcols, p1t,
                    precision=hi).reshape(cin * 9 + 1, n * hw1)       # (37, N*H1W1)
    w1_aug = jnp.concatenate(
        [w1.reshape(c1, cin * 9), b1[:, None]], axis=1).astype(jnp.float32)

    # stage-2 operator: conv2 shift mats folded with the 2x2 pool, stacked over
    # co, block-diagonal over the batch.
    s2 = jnp.asarray(_flat_conv_shift_mats(h1s, w1s))                 # (9, hw1, hw1)
    p2m = jnp.asarray(_flat_pool2_matrix(h1s, w1s))                   # (hw2, hw1)
    k2 = jnp.einsum('oit,tpq->oipq',
                    w2.reshape(cout, c1, 9).astype(jnp.float32), s2,
                    precision=hi)                                     # (Cout,C1,hw1,hw1)
    k2p = jnp.einsum('oipq,rp->oiqr', k2, p2m, precision=hi)          # (Cout,C1,hw1,hw2)
    k2p_ci = jnp.transpose(k2p, (1, 2, 0, 3)).reshape(c1, hw1, cout * hw2)
    b_op = jnp.einsum('ab,ipq->iapbq', jnp.eye(n, dtype=jnp.float32), k2p_ci,
                      precision=hi).reshape(c1, n * hw1, n * cout * hw2)

    # conv2 bias (applied post-pool, pre-ReLU) and block-diag adaptive GAP
    b2row = jnp.tile(jnp.repeat(b2.astype(jnp.float32), hw2), n)[None, :]
    gapt = jnp.asarray(_flat_adaptive_matrix(h2s, w2s, oh, ow).T)     # (hw2, og)
    gap_blk = jnp.kron(jnp.eye(n * cout, dtype=jnp.float32), gapt)    # (n*cout*hw2, n*cout*og)

    flops = 2 * (c1 * (cin * 9 + 1) * n * hw1
                 + c1 * (n * hw1) * (n * cout * hw2)
                 + (n * cout * hw2) * (n * cout * og))
    bytes_acc = 4 * (xp.size + w1_aug.size + b_op.size + b2row.size
                     + gap_blk.size + n * cout * og)

    out = pl.pallas_call(
        _make_fused_kernel(c1),
        out_shape=jax.ShapeDtypeStruct((1, n * cout * og), jnp.float32),
        grid=(1,),
        in_specs=[
            pl.BlockSpec((cin * 9 + 1, n * hw1), lambda i: (0, 0)),
            pl.BlockSpec((c1, cin * 9 + 1), lambda i: (0, 0)),
            pl.BlockSpec((c1, n * hw1, n * cout * hw2), lambda i: (0, 0, 0)),
            pl.BlockSpec((1, n * cout * hw2), lambda i: (0, 0)),
            pl.BlockSpec((n * cout * hw2, n * cout * og), lambda i: (0, 0)),
        ],
        out_specs=pl.BlockSpec((1, n * cout * og), lambda i: (0, 0)),
        compiler_params=pltpu.CompilerParams(
            dimension_semantics=("arbitrary",)),
        cost_estimate=pl.CostEstimate(flops=flops, transcendentals=0,
                                      bytes_accessed=bytes_acc),
    )(xp, w1_aug, b_op, b2row, gap_blk)

    # lane-flat column order is (n, co, i, j); match the module's .squeeze()
    return jnp.squeeze(out.reshape(n, cout, oh, ow))


# ---------------- pure-JAX reference (for verification only) ----------------

def _reference_forward(x, w1, b1, w2, b2, out_shape):
    def conv3x3(x, w, b):
        y = lax.conv_general_dilated(
            x, w, window_strides=(1, 1), padding=((1, 1), (1, 1)),
            dimension_numbers=("NCHW", "OIHW", "NCHW"))
        return y + b[None, :, None, None]

    def avgpool2(x):
        s = lax.reduce_window(x, 0.0, lax.add,
                              (1, 1, 2, 2), (1, 1, 2, 2), "VALID")
        return s / 4.0

    def adaptive_avg_pool(x, oh, ow):
        n, c, h, w = x.shape
        rows = []
        for i in range(oh):
            hs, he = (i * h) // oh, -(-((i + 1) * h) // oh)
            cols = []
            for j in range(ow):
                ws, we = (j * w) // ow, -(-((j + 1) * w) // ow)
                cols.append(jnp.mean(x[:, :, hs:he, ws:we], axis=(2, 3)))
            rows.append(jnp.stack(cols, axis=-1))
        return jnp.stack(rows, axis=-2)

    h = jax.nn.relu(avgpool2(conv3x3(x, w1, b1)))
    h = jax.nn.relu(avgpool2(conv3x3(h, w2, b2)))
    return jnp.squeeze(adaptive_avg_pool(h, out_shape[0], out_shape[1]))


if __name__ == "__main__":
    key = jax.random.PRNGKey(0)
    N, Cin, H, W = 2, 4, 16, 16          # ndims=2, in_channels=4
    C1 = Cin // 2                        # conv1: in_channels -> in_channels//2
    Cout = 1                             # conv2: in_channels//2 -> out_channels=1
    out_shape = (2, 3)                   # AdaptiveAvgPool2d output_size=[2, 3]

    k1, k2, kx = jax.random.split(key, 3)
    bound1 = 1.0 / (Cin * 9) ** 0.5      # deterministic PyTorch-default-ish init
    bound2 = 1.0 / (C1 * 9) ** 0.5
    w1 = jax.random.uniform(k1, (C1, Cin, 3, 3), jnp.float32, -bound1, bound1)
    w2 = jax.random.uniform(k2, (Cout, C1, 3, 3), jnp.float32, -bound2, bound2)
    b1 = jnp.zeros((C1,), jnp.float32)   # module zeroes conv biases in __init__
    b2 = jnp.zeros((Cout,), jnp.float32)
    x = jax.random.normal(kx, (N, Cin, H, W), jnp.float32)

    out = nin_gap_forward(x, w1, b1, w2, b2, out_shape)
    out = jax.block_until_ready(out)

    ref = _reference_forward(x, w1, b1, w2, b2, out_shape)
    assert out.shape == ref.shape, (out.shape, ref.shape)
    assert jnp.allclose(out, ref, atol=1e-4, rtol=1e-4), float(jnp.max(jnp.abs(out - ref)))
    print("KERNEL_OK")
</pallas_src>

<mosaic_0001>
module attributes {stable_mosaic.version = 11 : i64} {
  func.func @kernel(%arg0: i32, %arg1: memref<37x128xf32, #tpu.memory_space<vmem>>, %arg2: memref<2x37xf32, #tpu.memory_space<vmem>>, %arg3: memref<2x128x32xf32, #tpu.memory_space<vmem>>, %arg4: memref<1x32xf32, #tpu.memory_space<vmem>>, %arg5: memref<32x12xf32, #tpu.memory_space<vmem>>, %arg6: memref<1x12xf32, #tpu.memory_space<vmem>>) attributes {dimension_semantics = [#tpu.dimension_semantics<arbitrary>], iteration_bounds = array<i64: 1>, scalar_prefetch = 0 : i64, scratch_operands = 0 : i64, tpu.core_type = #tpu.core_type<tc>, window_params = [{pipeline_mode = #tpu.pipeline_mode<synchronous>, transform_indices = @transform_0, window_bounds = array<i64: 37, 128>}, {pipeline_mode = #tpu.pipeline_mode<synchronous>, transform_indices = @transform_1, window_bounds = array<i64: 2, 37>}, {pipeline_mode = #tpu.pipeline_mode<synchronous>, transform_indices = @transform_2, window_bounds = array<i64: 2, 128, 32>}, {pipeline_mode = #tpu.pipeline_mode<synchronous>, transform_indices = @transform_3, window_bounds = array<i64: 1, 32>}, {pipeline_mode = #tpu.pipeline_mode<synchronous>, transform_indices = @transform_4, window_bounds = array<i64: 32, 12>}, {pipeline_mode = #tpu.pipeline_mode<synchronous>, transform_indices = @transform_5, window_bounds = array<i64: 1, 12>}]} {
    %c0 = arith.constant 0 : index
    %c0_0 = arith.constant 0 : index
    %0 = vector.load %arg2[%c0, %c0_0] : memref<2x37xf32, #tpu.memory_space<vmem>>, vector<2x37xf32>
    %c0_1 = arith.constant 0 : index
    %c0_2 = arith.constant 0 : index
    %1 = vector.load %arg1[%c0_1, %c0_2] : memref<37x128xf32, #tpu.memory_space<vmem>>, vector<37x128xf32>
    %cst = arith.constant dense<0.000000e+00> : vector<2x128xf32>
    %2 = tpu.matmul %0, %1, %cst {dimension_numbers = #tpu.dot_dimension_numbers<[1], [0], [0], [1], [0, 0, 1, 1], [], []>} : vector<2x37xf32>, vector<37x128xf32>, vector<2x128xf32> -> vector<2x128xf32>
    %cst_3 = arith.constant 0.000000e+00 : f32
    %3 = vector.broadcast %cst_3 : f32 to vector<2x128xf32>
    %4 = arith.maximumf %2, %3 : vector<2x128xf32>
    %5 = vector.extract_strided_slice %4 {offsets = [0, 0], sizes = [1, 128], strides = [1, 1]} : vector<2x128xf32> to vector<1x128xf32>
    %c0_4 = arith.constant 0 : index
    %c0_5 = arith.constant 0 : index
    %c0_6 = arith.constant 0 : index
    %6 = vector.load %arg3[%c0_4, %c0_5, %c0_6] : memref<2x128x32xf32, #tpu.memory_space<vmem>>, vector<1x128x32xf32>
    %7 = vector.shape_cast %6 : vector<1x128x32xf32> to vector<128x32xf32>
    %cst_7 = arith.constant dense<0.000000e+00> : vector<1x32xf32>
    %8 = tpu.matmul %5, %7, %cst_7 {dimension_numbers = #tpu.dot_dimension_numbers<[1], [0], [0], [1], [0, 0, 1, 1], [], []>} : vector<1x128xf32>, vector<128x32xf32>, vector<1x32xf32> -> vector<1x32xf32>
    %9 = vector.extract_strided_slice %4 {offsets = [1, 0], sizes = [1, 128], strides = [1, 1]} : vector<2x128xf32> to vector<1x128xf32>
    %c1 = arith.constant 1 : index
    %c0_8 = arith.constant 0 : index
    %c0_9 = arith.constant 0 : index
    %10 = vector.load %arg3[%c1, %c0_8, %c0_9] : memref<2x128x32xf32, #tpu.memory_space<vmem>>, vector<1x128x32xf32>
    %11 = vector.shape_cast %10 : vector<1x128x32xf32> to vector<128x32xf32>
    %cst_10 = arith.constant dense<0.000000e+00> : vector<1x32xf32>
    %12 = tpu.matmul %9, %11, %cst_10 {dimension_numbers = #tpu.dot_dimension_numbers<[1], [0], [0], [1], [0, 0, 1, 1], [], []>} : vector<1x128xf32>, vector<128x32xf32>, vector<1x32xf32> -> vector<1x32xf32>
    %13 = arith.addf %8, %12 : vector<1x32xf32>
    %c0_11 = arith.constant 0 : index
    %c0_12 = arith.constant 0 : index
    %14 = vector.load %arg4[%c0_11, %c0_12] : memref<1x32xf32, #tpu.memory_space<vmem>>, vector<1x32xf32>
    %15 = arith.addf %13, %14 : vector<1x32xf32>
    %cst_13 = arith.constant 0.000000e+00 : f32
    %16 = vector.broadcast %cst_13 : f32 to vector<1x32xf32>
    %17 = arith.maximumf %15, %16 : vector<1x32xf32>
    %c0_14 = arith.constant 0 : index
    %c0_15 = arith.constant 0 : index
    %18 = vector.load %arg5[%c0_14, %c0_15] : memref<32x12xf32, #tpu.memory_space<vmem>>, vector<32x12xf32>
    %cst_16 = arith.constant dense<0.000000e+00> : vector<1x12xf32>
    %19 = tpu.matmul %17, %18, %cst_16 {dimension_numbers = #tpu.dot_dimension_numbers<[1], [0], [0], [1], [0, 0, 1, 1], [], []>} : vector<1x32xf32>, vector<32x12xf32>, vector<1x12xf32> -> vector<1x12xf32>
    %c0_17 = arith.constant 0 : index
    %c0_18 = arith.constant 0 : index
    %20 = vector.load %arg6[%c0_17, %c0_18] : memref<1x12xf32, #tpu.memory_space<vmem>>, vector<1x12xf32>
    tpu.vector_store %arg6[%c0_17, %c0_18], %19 {strides = array<i32>} : memref<1x12xf32, #tpu.memory_space<vmem>>, vector<1x12xf32>,
    return
  }
  func.func @transform_0(%arg0: i32) -> (i32, i32) {
    %c0_i32 = arith.constant 0 : i32
    %c0_i32_0 = arith.constant 0 : i32
    %c0_i32_1 = arith.constant 0 : i32
    return %c0_i32, %c0_i32_0 : i32, i32
  }
  func.func @transform_1(%arg0: i32) -> (i32, i32) {
    %c0_i32 = arith.constant 0 : i32
    %c0_i32_0 = arith.constant 0 : i32
    %c0_i32_1 = arith.constant 0 : i32
    return %c0_i32, %c0_i32_0 : i32, i32
  }
  func.func @transform_2(%arg0: i32) -> (i32, i32, i32) {
    %c0_i32 = arith.constant 0 : i32
    %c0_i32_0 = arith.constant 0 : i32
    %c0_i32_1 = arith.constant 0 : i32
    %c0_i32_2 = arith.constant 0 : i32
    return %c0_i32, %c0_i32_0, %c0_i32_1 : i32, i32, i32
  }
  func.func @transform_3(%arg0: i32) -> (i32, i32) {
    %c0_i32 = arith.constant 0 : i32
    %c0_i32_0 = arith.constant 0 : i32
    %c0_i32_1 = arith.constant 0 : i32
    return %c0_i32, %c0_i32_0 : i32, i32
  }
  func.func @transform_4(%arg0: i32) -> (i32, i32) {
    %c0_i32 = arith.constant 0 : i32
    %c0_i32_0 = arith.constant 0 : i32
    %c0_i32_1 = arith.constant 0 : i32
    return %c0_i32, %c0_i32_0 : i32, i32
  }
  func.func @transform_5(%arg0: i32) -> (i32, i32) {
    %c0_i32 = arith.constant 0 : i32
    %c0_i32_0 = arith.constant 0 : i32
    %c0_i32_1 = arith.constant 0 : i32
    return %c0_i32, %c0_i32_0 : i32, i32
  }
}

</mosaic_0001>

<bundles_post_ra>
// kernel: tpu_custom_call.1
= control target key start
LH: loop header
LB: loop body
LE: loop exit
PB: predicated region body
PF: predicated region fallthrough
CT: control target
= control target key end

     0   :  { %vm31_vm0 = vcmask 1044480   ;;  %v562_v1 = vmov 0.0   ;;  %vm563_vm1 = vmmov 0   ;;  %vm27_vm2 = vcmask 302080   ;;  %s776_s0 = inlined_call_operand.vmem [shape: f32[37,128], index: 0, kind: input, shape index: {}]   ;;  %s777_s1 = inlined_call_operand.vmem [shape: f32[2,37], index: 1, kind: input, shape index: {}]   ;;  %s778_s2 = inlined_call_operand.vmem [shape: f32[2,128,32], index: 2, kind: input, shape index: {}]   ;;  %s779_s3 = inlined_call_operand.vmem [shape: f32[1,32], index: 3, kind: input, shape index: {}]   ;;  %s780_s4 = inlined_call_operand.vmem [shape: f32[32,12], index: 4, kind: input, shape index: {}]   ;;  %s781_s5 = inlined_call_operand.hbm [shape: f32[1,12], index: 5, kind: output, shape index: {}]  }
   0x1   :  { %v26_v0 = vld [vmem:[%s776_s0 + $0x20] sm:$0x1f]  ;;  %443 = vmatprep.subr.mxu0 %v562_v1  ;;  %v25_v2 = vld [vmem:[%s776_s0 + $0x18] sm:$0xff]  ;;  %456 = vmatprep.subr.mxu1 %v562_v1  ;;  %v24_v4 = vld [vmem:[%s776_s0 + $0x10] sm:$0xff] }
   0x2   :  { %444 = vmatpush3.msk.msra.mxu0 %vm31_vm0, %v26_v0  ;;  %453 = vmatprep.mubr.msk.f32.mxu0 %vm563_vm1, %v562_v1  ;;  %v396_v3 = vld [vmem:[%s778_s2 + $0xf8] sm:$0xff]  ;;  %v395_v5 = vld [vmem:[%s778_s2 + $0xf0] sm:$0xff]  ;;  %v394_v6 = vld [vmem:[%s778_s2 + $0xe8] sm:$0xff] }
   0x3   :  { %445 = vmatprep.subr.mxu0 %v562_v1  ;;  %457 = vmatpush3.msra.mxu1 %v396_v3  ;;  %v23_v7 = vld [vmem:[%s776_s0 + $0x8] sm:$0xff]  ;;  %v393_v8 = vld [vmem:[%s778_s2 + $0xe0] sm:$0xff]  ;;  %v121_v11 = vld [vmem:[%s778_s2 + $0x78] sm:$0xff] }
   0x4   :  { %446 = vmatpush3.msra.mxu0 %v25_v2  ;;  %458 = vmatprep.subr.mxu1 %v562_v1  ;;  %v22_v9 = vld [vmem:[%s776_s0] sm:$0xff]  ;;  %v392_v12 = vld [vmem:[%s778_s2 + $0xd8] sm:$0xff]  ;;  %v120_v13 = vld [vmem:[%s778_s2 + $0x70] sm:$0xff] }
   0x5   :  { %447 = vmatprep.subr.mxu0 %v562_v1  ;;  %459 = vmatpush3.msra.mxu1 %v395_v5  ;;  %v21_v10 = vld [vmem:[%s777_s1] sm:$0x3]  ;;  %v391_v14 = vld [vmem:[%s778_s2 + $0xd0] sm:$0xff] }
   0x6   :  { %448 = vmatpush3.msra.mxu0 %v24_v4  ;;  %460 = vmatprep.subr.mxu1 %v562_v1 }
   0x7   :  { %449 = vmatprep.subr.mxu0 %v562_v1  ;;  %461 = vmatpush3.msra.mxu1 %v394_v6 }
   0x8   :  { %450 = vmatpush3.msra.mxu0 %v23_v7  ;;  %462 = vmatprep.subr.mxu1 %v562_v1 }
   0x9   :  { %451 = vmatprep.subr.mxu0 %v562_v1  ;;  %463 = vmatpush3.msra.mxu1 %v393_v8 }
   0xa   :  { %452 = vmatpush3.msra.mxu0 %v22_v9  ;;  %464 = vmatprep.subr.mxu1 %v562_v1 }
   0xb   :  { %454 = vmatmul.mubr.msk.f32.vlgmr.msra.gmra.mxu0 %vm27_vm2, %v21_v10  ;;  %491 = vmatprep.subr.mxu0 %v562_v1 }
   0xc   :  { %10 = vsyncpa [#allocation3], 0  ;;  %492 = vmatpush3.msra.mxu0 %v121_v11  ;;  %465 = vmatpush3.msra.mxu1 %v392_v12  ;;  %v119_v15 = vld [vmem:[%s778_s2 + $0x68] sm:$0xff]  ;;  %v118_v17 = vld [vmem:[%s778_s2 + $0x60] sm:$0xff]  ;;  %vm289_vm3 = vcmask 261120   ;;  %s564_s22 = smov [#allocation2]  }
   0xd   :  { %493 = vmatprep.subr.mxu0 %v562_v1  ;;  %466 = vmatprep.subr.mxu1 %v562_v1  ;;  %v390_v16 = vld [vmem:[%s778_s2 + $0xc8] sm:$0xff]  ;;  %v389_v18 = vld [vmem:[%s778_s2 + $0xc0] sm:$0xff]  ;;  %v117_v19 = vld [vmem:[%s778_s2 + $0x58] sm:$0xff]  ;;  %s371_s23 = sshll.u32 %s564_s22, 4  ;;  %vm363_vm4 = vcmask 90112   ;;  %s372_s23 = int_to_ptr.vmem [resolvable:$true] %s371_s23 }
   0xe   :  { %494 = vmatpush3.msra.mxu0 %v120_v13  ;;  %467 = vmatpush3.msra.mxu1 %v391_v14  ;;  %v388_v20 = vld [vmem:[%s778_s2 + $0xb8] sm:$0xff]  ;;  %v116_v21 = vld [vmem:[%s778_s2 + $0x50] sm:$0xff]  ;;  %v115_v23 = vld [vmem:[%s778_s2 + $0x48] sm:$0xff]  ;;  %s544_s24 = scalar_lea.vmem %s372_s23, 32  ;;  %p545_p1 = scmp.lt.s32.totalorder %s372_s23, %s372_s23 }
   0xf   :  { %495 = vmatprep.subr.mxu0 %v562_v1  ;;  %468 = vmatprep.subr.mxu1 %v562_v1  ;;  %v387_v22 = vld [vmem:[%s778_s2 + $0xb0] sm:$0xff]  ;;  %v386_v24 = vld [vmem:[%s778_s2 + $0xa8] sm:$0xff]  ;;  %v114_v25 = vld [vmem:[%s778_s2 + $0x40] sm:$0xff] }
  0x10   :  { %496 = vmatpush3.msra.mxu0 %v119_v15  ;;  %469 = vmatpush3.msra.mxu1 %v390_v16  ;;  %v385_v26 = vld [vmem:[%s778_s2 + $0xa0] sm:$0xff]  ;;  %v113_v27 = vld [vmem:[%s778_s2 + $0x38] sm:$0xff]  ;;  %v112_v29 = vld [vmem:[%s778_s2 + $0x30] sm:$0xff] }
  0x11   :  { %497 = vmatprep.subr.mxu0 %v562_v1  ;;  %470 = vmatprep.subr.mxu1 %v562_v1  ;;  %v384_v28 = vld [vmem:[%s778_s2 + $0x98] sm:$0xff]  ;;  %v111_v30 = vld [vmem:[%s778_s2 + $0x28] sm:$0xff]  ;;  %v110_v31 = vld [vmem:[%s778_s2 + $0x20] sm:$0xff] }
  0x12   :  { %498 = vmatpush3.msra.mxu0 %v118_v17  ;;  %471 = vmatpush3.msra.mxu1 %v389_v18  ;;  %v109_v32 = vld [vmem:[%s778_s2 + $0x18] sm:$0xff]  ;;  %v108_v33 = vld [vmem:[%s778_s2 + $0x10] sm:$0xff]  ;;  %v107_v35 = vld [vmem:[%s778_s2 + $0x8] sm:$0xff] }
  0x13   :  { %499 = vmatprep.subr.mxu0 %v562_v1  ;;  %472 = vmatprep.subr.mxu1 %v562_v1  ;;  %v383_v34 = vld [vmem:[%s778_s2 + $0x90] sm:$0xff]  ;;  %v382_v36 = vld [vmem:[%s778_s2 + $0x88] sm:$0xff]  ;;  %v106_v37 = vld [vmem:[%s778_s2] sm:$0xff] }
  0x14   :  { %500 = vmatpush3.msra.mxu0 %v117_v19  ;;  %473 = vmatpush3.msra.mxu1 %v388_v20  ;;  %v381_v38 = vld [vmem:[%s778_s2 + $0x80] sm:$0xff]  ;;  %v288_v43 = vld [vmem:[%s780_s4 + $0x18] sm:$0xff]  ;;  %v287_v44 = vld [vmem:[%s780_s4 + $0x10] sm:$0xff] }
  0x15   :  { %501 = vmatprep.subr.mxu0 %v562_v1  ;;  %474 = vmatprep.subr.mxu1 %v562_v1  ;;  %v286_v45 = vld [vmem:[%s780_s4 + $0x8] sm:$0xff]  ;;  %v285_v46 = vld [vmem:[%s780_s4] sm:$0xff]  ;;  %s540_s4 = scalar_lea.vmem %s372_s23, 16 }
  0x16   :  { %502 = vmatpush3.msra.mxu0 %v116_v21  ;;  %475 = vmatpush3.msra.mxu1 %v387_v22  ;;  %v282_v49 = vld [vmem:[%s779_s3] sm:$0x1]  ;;  %p541_p0 = scmp.ne.s32.totalorder %s372_s23, %s540_s4  ;;  %p546_p2 = scmp.lt.s32.totalorder %s544_s24, %s540_s4 }
  0x17   :  { %503 = vmatprep.subr.mxu0 %v562_v1  ;;  %476 = vmatprep.subr.mxu1 %v562_v1 }
  0x18   :  { %504 = vmatpush3.msra.mxu0 %v115_v23  ;;  %477 = vmatpush3.msra.mxu1 %v386_v24  ;;  %p547_p3 = por %p546_p2, %p545_p1 }
  0x19   :  { %505 = vmatprep.subr.mxu0 %v562_v1  ;;  %478 = vmatprep.subr.mxu1 %v562_v1 }
  0x1a   :  { %506 = vmatpush3.msra.mxu0 %v114_v25  ;;  %479 = vmatpush3.msra.mxu1 %v385_v26  ;;  %p548_p4 = pnand %p547_p3, %p541_p0 }
  0x1b   :  { %507 = vmatprep.subr.mxu0 %v562_v1  ;;  %480 = vmatprep.subr.mxu1 %v562_v1 }
  0x1c   :  { %508 = vmatpush3.msra.mxu0 %v113_v27  ;;  %481 = vmatpush3.msra.mxu1 %v384_v28 }
  0x1d   :  { %509 = vmatprep.subr.mxu0 %v562_v1  ;;  %482 = vmatprep.subr.mxu1 %v562_v1 }
  0x1e   :  { %510 = vmatpush3.msra.mxu0 %v112_v29  ;;  %523 = vmatprep.mubr.msk.f32.mxu0 %vm563_vm1, %v562_v1 }
  0x1f   :  { %511 = vmatprep.subr.mxu0 %v562_v1  ;;  %488 = vmatprep.mubr.msk.f32.mxu1 %vm563_vm1, %v562_v1 }
  0x20   :  { %512 = vmatpush3.msra.mxu0 %v111_v30  ;;  %483 = vmatpush3.msra.mxu1 %v383_v34 }
  0x21   :  { %513 = vmatprep.subr.mxu0 %v562_v1  ;;  %484 = vmatprep.subr.mxu1 %v562_v1 }
  0x22   :  { %514 = vmatpush3.msra.mxu0 %v110_v31  ;;  %485 = vmatpush3.msra.mxu1 %v382_v36 }
  0x23   :  { %515 = vmatprep.subr.mxu0 %v562_v1  ;;  %486 = vmatprep.subr.mxu1 %v562_v1 }
  0x24   :  { %516 = vmatpush3.msra.mxu0 %v109_v32  ;;  %487 = vmatpush3.msra.mxu1 %v381_v38 }
  0x25   :  { %517 = vmatprep.subr.mxu0 %v562_v1  ;;  %526 = vmatprep.subr.mxu1 %v562_v1 }
  0x26   :  { %518 = vmatpush3.msra.mxu0 %v108_v33 }
  0x27   :  { %519 = vmatprep.subr.mxu0 %v562_v1 }
  0x28   :  { %520 = vmatpush3.msra.mxu0 %v107_v35 }
  0x29   :  { %521 = vmatprep.subr.mxu0 %v562_v1 }
  0x2a   :  { %522 = vmatpush3.msra.mxu0 %v106_v37 }
  0xcb   :  { %v101_v39 = vpop.f32.mrf.mxu0 }
  0xcc   :  { %v105_v40 = vmax.f32 %v101_v39, 0.0 }
  0xcd   :  { %v455_v41 = vpop.f32.mrf.mxu0 }
  0xce   :  { %v140_v42 = vrot.slane %v105_v40, 1  ;;  %524 = vmatmul.mubr.f32.vlgmr.msra.gmra.mxu0 %v105_v40 }
  0xd0   :  { %489 = vmatmul.mubr.f32.vlgmr.msra.gmra.mxu1 %v140_v42 }
  0xd1   :  { %534 = vmatprep.mubr.msk.f32.mxu1 %vm563_vm1, %v562_v1  ;;  %527 = vmatpush3.msra.mxu1 %v288_v43 }
  0xd2   :  { %528 = vmatprep.subr.mxu1 %v562_v1 }
  0xd3   :  { %529 = vmatpush3.msra.mxu1 %v287_v44 }
  0xd4   :  { %530 = vmatprep.subr.mxu1 %v562_v1 }
  0xd5   :  { %531 = vmatpush3.msra.mxu1 %v286_v45 }
  0xd6   :  { %532 = vmatprep.subr.mxu1 %v562_v1 }
  0xd7   :  { %533 = vmatpush3.msra.mxu1 %v285_v46 }
 0x18e   :  { %v278_v47 = vpop.f32.mrf.mxu0 }
 0x190   :  { %v208_v48 = vpop.f32.mrf.mxu1  ;;  %v525_v50 = vpop.f32.mrf.mxu0 }
 0x191   :  { %v279_v51 = vadd.f32 %v278_v47, %v208_v48 }
 0x192   :  { %v490_v52 = vpop.f32.mrf.mxu1 }
 0x193   :  { %v283_v53 = vadd.f32 %v282_v49, %v279_v51 }
 0x195   :  { %v284_v54 = vmax.f32 %v283_v53, 0.0 }
 0x197   :  { %535 = vmatmul.mubr.msk.f32.vlgmr.msra.gmra.mxu1 %vm289_vm3, %v284_v54 }
 0x257   :  { %v359_v55 = vpop.f32.mrf.mxu1 }
 0x258   :  { %364 = vst.msk [vmem:[#allocation2] sm:$0x1] %vm363_vm4, %v359_v55 }
 0x259   :  { %v536_v56 = vpop.f32.mrf.mxu1 }
 0x25a   :  { %551 = shalt.err (!%p548_p4)
}
 0x25b   :  { %374 = dma.vmem_to_hbm [thread:$0]  %s372_s23, 16, %s781_s5, [#allocation3]  }
 0x25c   :  { %560 = dma.done.wait [#allocation3], 16  }
 0x25d   :  { %561 = vsyncadd [#allocation3], 4294967280 }
 0x25e   :  { %378 = vsyncpa [#allocation3], 1 }

</bundles_post_ra>
